<compile_context>
chip_gen: v6e
topology: v6e:2x2x1
jax: 0.10.0
libtpu: 0.0.40
codegen_flags: <defaults>
</compile_context>

<pallas_src>
import math
import functools

import jax
import jax.numpy as jnp
from jax import lax
from jax.experimental import pallas as pl
from jax.experimental.pallas import tpu as pltpu


_VMEM_LIMIT = 32 * 1024 * 1024   # explicit scoped-VMEM limit (safe on v5e/v6e/v7x)


# ----------------------------- Pallas kernels -----------------------------

def _hyena_pre_kernel(x_ref, w_in_ref, b_in_ref, sf0_ref, sf1_ref, sf2_ref, b_sf_ref,
                      x0_ref, v_ref, *, d_model, seq_pad):
    """in_proj + causal width-3 depthwise short filter + pre-conv gate.

    Layout (D, B*S_pad): channels on sublanes, fused (batch, seq) on lanes.  A single MXU
    matmul with N = B*S_pad replaces the old per-batch loop; the short filter is two lane
    rolls masked with the within-batch position (pos % S_pad) so rolls never leak across the
    batch boundary."""
    x = x_ref[...]                                                      # (D, B*S_pad) f32
    u = jnp.dot(w_in_ref[...], x.astype(jnp.bfloat16),
                preferred_element_type=jnp.float32) + b_in_ref[...]     # (3D, BS) f32
    bs = x.shape[1]
    pos = lax.broadcasted_iota(jnp.int32, (1, bs), 1) % seq_pad         # within-batch position
    u1 = jnp.where(pos >= 1, pltpu.roll(u, 1, axis=1), 0.0)             # u[t-1]
    u2 = jnp.where(pos >= 2, pltpu.roll(u, 2, axis=1), 0.0)             # u[t-2]
    uc = u2 * sf0_ref[...] + u1 * sf1_ref[...] + u * sf2_ref[...] + b_sf_ref[...]

    x0 = uc[0:d_model, :]
    x1 = uc[d_model:2 * d_model, :]
    v = uc[2 * d_model:3 * d_model, :]
    x0_ref[...] = x0                                                    # post-conv gate input
    v_ref[...] = v * x1                                                 # conv input (gated)


def _hyena_conv_post_kernel(vb_ref, va_ref, k_ref, x_ref, x0_ref,
                            w_out_ref, b_out_ref, g1_ref, be1_ref,
                            w_ff1_ref, b_ff1_ref, w_ff2_ref, b_ff2_ref,
                            g2_ref, be2_ref, out_ref, acc_ref,
                            *, tile, n_m, eps):
    """Fused (causal long conv -> output gate -> out_proj -> LN1 -> FFN -> LN2).

    grid = (fused query tile i [parallel], tau tile m [arbitrary]).  For query tile i (local
    index li within its batch) and tau block m (filter offsets [m*T, (m+1)*T)):
        y[:, r] += sum_dt k[m*T + dt] * v[:, (li-m)*T + r - dt]
    The two v tiles needed ((li-m) and (li-m-1)) are delivered by BlockSpec, so every slice in
    the kernel is static.  Non-causal (m > li) steps skip compute AND (via clamped index maps)
    their DMA.  The finalize applies the whole post stage to the finished tile."""
    i = pl.program_id(0)
    m = pl.program_id(1)
    li = i % n_m                               # query-tile index within its batch

    @pl.when(m == 0)
    def _init():
        acc_ref[...] = jnp.zeros_like(acc_ref)

    @pl.when(m <= li)                          # causal skip (upper-tri steps do nothing)
    def _accumulate():
        kblk = k_ref[...]                                       # (D, T): taus [m*T,(m+1)*T)
        vb = vb_ref[...]                                        # v tile (li - m)
        va = jnp.where(m == li, 0.0, va_ref[...])               # v tile (li - m - 1); 0 on diag
        w = jnp.concatenate([va, vb], axis=1)                   # (D, 2T) sliding window
        acc = acc_ref[...]
        for dt in range(tile):                                  # static unroll: static slices
            acc = acc + kblk[:, dt:dt + 1] * w[:, tile - dt:2 * tile - dt]
        acc_ref[...] = acc

    @pl.when(m == n_m - 1)
    def _finalize():
        # Hyena output gate + out_proj (activation = identity)
        y = acc_ref[...] * x0_ref[...]
        y = jnp.dot(w_out_ref[...], y.astype(jnp.bfloat16),
                    preferred_element_type=jnp.float32) + b_out_ref[...]
        # residual + LayerNorm1 (post-norm, over the channel/sublane axis)
        h = x_ref[...] + y
        mu = jnp.mean(h, axis=0, keepdims=True)
        var = jnp.mean((h - mu) ** 2, axis=0, keepdims=True)
        h = (h - mu) * lax.rsqrt(var + eps) * g1_ref[...] + be1_ref[...]
        # feed-forward: Linear -> ReLU -> Linear
        f = jnp.dot(w_ff1_ref[...], h.astype(jnp.bfloat16),
                    preferred_element_type=jnp.float32) + b_ff1_ref[...]
        f = jnp.maximum(f, 0.0)
        f = jnp.dot(w_ff2_ref[...], f.astype(jnp.bfloat16),
                    preferred_element_type=jnp.float32) + b_ff2_ref[...]
        # residual + LayerNorm2
        h2 = h + f
        mu2 = jnp.mean(h2, axis=0, keepdims=True)
        var2 = jnp.mean((h2 - mu2) ** 2, axis=0, keepdims=True)
        out_ref[...] = (h2 - mu2) * lax.rsqrt(var2 + eps) * g2_ref[...] + be2_ref[...]


# ----------------------------- pallas_call wrappers -----------------------------

def _hyena_pre(x_f, lp, *, d_model, seq_pad):
    D, BS = x_f.shape
    kern = functools.partial(_hyena_pre_kernel, d_model=d_model, seq_pad=seq_pad)
    return pl.pallas_call(
        kern,
        out_shape=(jax.ShapeDtypeStruct((D, BS), jnp.float32),   # x0 (output gate)
                   jax.ShapeDtypeStruct((D, BS), jnp.float32)),  # gated conv input v
        compiler_params=pltpu.CompilerParams(vmem_limit_bytes=_VMEM_LIMIT),
    )(x_f, lp['w_in'], lp['b_in'], lp['w_sf0'], lp['w_sf1'], lp['w_sf2'], lp['b_sf'])


def _hyena_conv_post(x_f, x0_f, v_f, k_arr, lp, *, tile, n_m, eps=1e-5):
    D, BS = x_f.shape
    n_q = BS // tile

    # Clamped index maps: once m exceeds li the block indices freeze, so Pallas dedupes the
    # DMA for the skipped (non-causal) steps.
    def vb_map(i, m):
        b = i // n_m
        li = i % n_m
        mm = jnp.minimum(m, li)
        return (0, b * n_m + li - mm)

    def va_map(i, m):
        b = i // n_m
        li = i % n_m
        mm = jnp.minimum(m, li)
        return (0, b * n_m + jnp.maximum(li - mm - 1, 0))

    def k_map(i, m):
        return (0, jnp.minimum(m, i % n_m))

    def q_map(i, m):
        return (0, i)

    def w_map(i, m):
        return (0, 0)

    kern = functools.partial(_hyena_conv_post_kernel, tile=tile, n_m=n_m, eps=eps)
    cost = pl.CostEstimate(
        flops=int(D * BS * n_m * tile),                         # ~causal half of 2*D*BS*S_pad
        transcendentals=0,
        bytes_accessed=int(4 * D * BS * 4 + D * BS * (n_m + 1) * 2))
    return pl.pallas_call(
        kern,
        grid=(n_q, n_m),
        in_specs=[pl.BlockSpec((D, tile), vb_map),              # v tile (li - m)
                  pl.BlockSpec((D, tile), va_map),              # v tile (li - m - 1)
                  pl.BlockSpec((D, tile), k_map),               # filter taus [m*T,(m+1)*T)
                  pl.BlockSpec((D, tile), q_map),               # x (residual), query tile
                  pl.BlockSpec((D, tile), q_map),               # x0 (gate), query tile
                  pl.BlockSpec(lp['w_out'].shape, w_map),
                  pl.BlockSpec(lp['b_out'].shape, w_map),
                  pl.BlockSpec(lp['g1'].shape, w_map),
                  pl.BlockSpec(lp['be1'].shape, w_map),
                  pl.BlockSpec(lp['w_ff1'].shape, w_map),
                  pl.BlockSpec(lp['b_ff1'].shape, w_map),
                  pl.BlockSpec(lp['w_ff2'].shape, w_map),
                  pl.BlockSpec(lp['b_ff2'].shape, w_map),
                  pl.BlockSpec(lp['g2'].shape, w_map),
                  pl.BlockSpec(lp['be2'].shape, w_map)],
        out_specs=pl.BlockSpec((D, tile), q_map),
        out_shape=jax.ShapeDtypeStruct((D, BS), jnp.float32),
        scratch_shapes=[pltpu.VMEM((D, tile), jnp.float32)],
        compiler_params=pltpu.CompilerParams(
            dimension_semantics=("parallel", "arbitrary"),
            vmem_limit_bytes=_VMEM_LIMIT),
        cost_estimate=cost,
    )(v_f, v_f, k_arr, x_f, x0_f,
      lp['w_out'], lp['b_out'], lp['g1'], lp['be1'],
      lp['w_ff1'], lp['b_ff1'], lp['w_ff2'], lp['b_ff2'], lp['g2'], lp['be2'])


# ------------------- Hyena implicit filter (plain JAX glue, position-only) -------------------

def _hyena_filter_k(lp, L, seq_len, d_model):
    """HyenaFilter.filter(L): positional features -> Sin-MLP -> exponential modulation."""
    emb_dim = 3
    t = jnp.linspace(0.0, 1.0, seq_len)[None, :, None]
    bands = (emb_dim - 1) // 2
    t_resc = jnp.linspace(0.0, seq_len - 1.0, seq_len)[None, :, None]
    ang = 2.0 * math.pi * t_resc / seq_len
    f = jnp.linspace(1e-4, float(bands - 1), bands)[None, None, :]
    z = jnp.concatenate([t, jnp.cos(f * ang), -jnp.sin(f * ang)], axis=-1)   # (1, seq_len, 3)
    z = z[:, :L]
    t_l = t[:, :L]

    freq = lp['sin_freq']
    h = jnp.sin(freq * (z @ lp['fW0'] + lp['fb0']))
    h = jnp.sin(freq * (h @ lp['fW1'] + lp['fb1']))
    h = jnp.sin(freq * (h @ lp['fW2'] + lp['fb2']))
    h = h @ lp['fW3']                                                        # (1, L, d_model)

    fast_decay_pct, slow_decay_pct, target = 0.3, 1.5, 1e-2
    max_decay = math.log(target) / fast_decay_pct
    min_decay = math.log(target) / slow_decay_pct
    deltas = jnp.linspace(min_decay, max_decay, d_model)[None, None, :]
    decay = jnp.exp(-t_l * jnp.abs(deltas))
    return (h * decay)[0]                                                    # (L, d_model)


def _filter_lanes(k, bias, seq_pad):
    """Pack the causal filter channel-major with taus on lanes: (D, S_pad) f32; fold the
    fftconv bias into the tau=0 column; zero response beyond l_max / up to S_pad."""
    L, D = k.shape
    k_arr = jnp.zeros((D, seq_pad), jnp.float32)
    k_arr = k_arr.at[:, :L].set(jnp.transpose(k))
    k_arr = k_arr.at[:, 0].add(bias)
    return k_arr


# ----------------------------- parameters -----------------------------

def init_params(key, d_model=8, num_layers=2, vocab=10, order=2, filter_order=64):
    assert order == 2, "this implementation mirrors the default order=2 Hyena recurrence"
    ffn = 4 * d_model
    inner = d_model * (order + 1)
    keys = jax.random.split(key, num_layers + 1)

    def nrm(k, shape, s, dtype=jnp.float32):
        return (s * jax.random.normal(k, shape, jnp.float32)).astype(dtype)

    # sqrt(d_model) scale folded directly into the embedding table
    emb = (0.02 * math.sqrt(d_model)) * jax.random.normal(keys[0], (vocab, d_model), jnp.float32)

    layers = []
    for li in range(num_layers):
        ks = jax.random.split(keys[li + 1], 12)
        lp = dict(
            # Hyena operator (channels-first orientation, matmul weights in bf16)
            w_in=nrm(ks[0], (inner, d_model), 1.0 / math.sqrt(d_model), jnp.bfloat16),
            b_in=jnp.zeros((inner, 1), jnp.float32),
            w_sf0=nrm(ks[1], (inner, 1), 1.0 / math.sqrt(3.0)),    # tap for u[t-2]
            w_sf1=nrm(ks[2], (inner, 1), 1.0 / math.sqrt(3.0)),    # tap for u[t-1]
            w_sf2=nrm(ks[3], (inner, 1), 1.0 / math.sqrt(3.0)),    # tap for u[t]
            b_sf=jnp.zeros((inner, 1), jnp.float32),
            w_out=nrm(ks[4], (d_model, d_model), 1.0 / math.sqrt(d_model), jnp.bfloat16),
            b_out=jnp.zeros((d_model, 1), jnp.float32),
            # implicit long-filter MLP (HyenaFilter: emb_dim=3, order=64, shared Sin), host-side
            sin_freq=jnp.ones((1, filter_order), jnp.float32),
            fW0=nrm(ks[5], (3, filter_order), 1.0 / math.sqrt(3.0)),
            fb0=jnp.zeros((filter_order,), jnp.float32),
            fW1=nrm(ks[6], (filter_order, filter_order), 1.0 / math.sqrt(filter_order)),
            fb1=jnp.zeros((filter_order,), jnp.float32),
            fW2=nrm(ks[7], (filter_order, filter_order), 1.0 / math.sqrt(filter_order)),
            fb2=jnp.zeros((filter_order,), jnp.float32),
            fW3=nrm(ks[8], (filter_order, d_model), 1.0 / math.sqrt(filter_order)),
            filter_bias=jax.random.normal(ks[9], (d_model,), jnp.float32),
            # encoder-layer norms + FFN
            g1=jnp.ones((d_model, 1), jnp.float32),
            be1=jnp.zeros((d_model, 1), jnp.float32),
            w_ff1=nrm(ks[10], (ffn, d_model), 1.0 / math.sqrt(d_model), jnp.bfloat16),
            b_ff1=jnp.zeros((ffn, 1), jnp.float32),
            w_ff2=nrm(ks[11], (d_model, ffn), 1.0 / math.sqrt(ffn), jnp.bfloat16),
            b_ff2=jnp.zeros((d_model, 1), jnp.float32),
            g2=jnp.ones((d_model, 1), jnp.float32),
            be2=jnp.zeros((d_model, 1), jnp.float32),
        )
        layers.append(lp)
    return dict(embedding=emb, layers=layers)


# ----------------------------- forward -----------------------------

def hyena_regressor_forward(tokens, params, d_model, max_pos):
    B, S = tokens.shape
    D = d_model
    # Embedding: plain-JAX row gather (scale already folded into the table)
    x = jnp.take(params['embedding'], tokens, axis=0)       # (B, S, D)

    # Pad the sequence to a lane-aligned length; padded positions only ever contaminate
    # padded positions (every op is position-wise or causal) and are sliced off at the end.
    seq_pad = ((S + 127) // 128) * 128
    x = jnp.pad(x, ((0, 0), (0, seq_pad - S), (0, 0)))
    x_f = jnp.transpose(x, (2, 0, 1)).reshape(D, B * seq_pad)   # (D, B*S_pad), fused lanes

    # tile <= 256 keeps per-step VMEM tiny on every generation (v7x included)
    tile = 256 if seq_pad % 256 == 0 else 128
    n_m = seq_pad // tile
    L = min(S, max_pos)

    for lp in params['layers']:
        k = _hyena_filter_k(lp, L, max_pos, d_model)            # (L, D) implicit filter
        k_arr = _filter_lanes(k, lp['filter_bias'], seq_pad)    # (D, S_pad) f32, stays in VMEM
        x0_f, v_f = _hyena_pre(x_f, lp, d_model=d_model, seq_pad=seq_pad)
        x_f = _hyena_conv_post(x_f, x0_f, v_f, k_arr, lp, tile=tile, n_m=n_m)

    out = x_f.reshape(D, B, seq_pad)
    out = jnp.transpose(out, (1, 2, 0))                         # (B, S_pad, D)
    return out[:, :S, :]


if __name__ == "__main__":
    key = jax.random.PRNGKey(0)
    B, S = 2, 16
    d_model, num_layers, max_pos = 8, 2, 64

    k_params, k_tok = jax.random.split(key)
    params = init_params(k_params, d_model=d_model, num_layers=num_layers)
    tokens = jax.random.randint(k_tok, (B, S), 0, 10, dtype=jnp.int32)   # vocab = 10

    out = hyena_regressor_forward(tokens, params, d_model, max_pos)
    out = jax.block_until_ready(out)

    assert out.shape == (B, S, d_model)
    assert bool(jnp.all(jnp.isfinite(out)))
    print("KERNEL_OK")
</pallas_src>

<mosaic_0001>
module attributes {stable_mosaic.version = 11 : i64} {
  func.func @_hyena_pre_kernel(%arg0: memref<8x256xf32, #tpu.memory_space<vmem>>, %arg1: memref<24x8xbf16, #tpu.memory_space<vmem>>, %arg2: memref<24x1xf32, #tpu.memory_space<vmem>>, %arg3: memref<24x1xf32, #tpu.memory_space<vmem>>, %arg4: memref<24x1xf32, #tpu.memory_space<vmem>>, %arg5: memref<24x1xf32, #tpu.memory_space<vmem>>, %arg6: memref<24x1xf32, #tpu.memory_space<vmem>>, %arg7: memref<8x256xf32, #tpu.memory_space<vmem>>, %arg8: memref<8x256xf32, #tpu.memory_space<vmem>>) attributes {dimension_semantics = [], scalar_prefetch = 0 : i64, scratch_operands = 0 : i64, tpu.core_type = #tpu.core_type<tc>} {
    %c0 = arith.constant 0 : index
    %c0_0 = arith.constant 0 : index
    %0 = vector.load %arg0[%c0, %c0_0] : memref<8x256xf32, #tpu.memory_space<vmem>>, vector<8x256xf32>
    %c0_1 = arith.constant 0 : index
    %c0_2 = arith.constant 0 : index
    %1 = vector.load %arg1[%c0_1, %c0_2] : memref<24x8xbf16, #tpu.memory_space<vmem>>, vector<24x8xbf16>
    %2 = arith.truncf %0 : vector<8x256xf32> to vector<8x256xbf16>
    %cst = arith.constant dense<0.000000e+00> : vector<24x256xf32>
    %3 = tpu.matmul %1, %2, %cst {dimension_numbers = #tpu.dot_dimension_numbers<[1], [0], [0], [1], [0, 0, 1, 1], [], []>} : vector<24x8xbf16>, vector<8x256xbf16>, vector<24x256xf32> -> vector<24x256xf32>
    %c0_3 = arith.constant 0 : index
    %c0_4 = arith.constant 0 : index
    %4 = vector.load %arg2[%c0_3, %c0_4] : memref<24x1xf32, #tpu.memory_space<vmem>>, vector<24x1xf32>
    %5 = vector.broadcast %4 : vector<24x1xf32> to vector<24x256xf32>
    %6 = arith.addf %3, %5 : vector<24x256xf32>
    %7 = tpu.iota {dimensions = array<i32: 1>} : vector<1x256xi32>
    %c128_i32 = arith.constant 128 : i32
    %c0_i32 = arith.constant 0 : i32
    %8 = arith.cmpi eq, %c128_i32, %c0_i32 : i32
    %c1_i32 = arith.constant 1 : i32
    %9 = arith.select %8, %c1_i32, %c128_i32 : i32
    %10 = vector.broadcast %9 : i32 to vector<1x256xi32>
    %11 = arith.remsi %7, %10 : vector<1x256xi32>
    %c0_i32_5 = arith.constant 0 : i32
    %12 = vector.broadcast %c0_i32_5 : i32 to vector<1x256xi32>
    %13 = arith.cmpi ne, %11, %12 : vector<1x256xi32>
    %c0_i32_6 = arith.constant 0 : i32
    %14 = vector.broadcast %c0_i32_6 : i32 to vector<1x256xi32>
    %15 = arith.cmpi slt, %11, %14 : vector<1x256xi32>
    %c0_i32_7 = arith.constant 0 : i32
    %16 = arith.cmpi slt, %9, %c0_i32_7 : i32
    %17 = vector.broadcast %16 : i1 to vector<1x256xi1>
    %18 = vector.broadcast %17 : vector<1x256xi1> to vector<1x256xi1>
    %19 = arith.xori %15, %18 : vector<1x256xi1>
    %20 = arith.andi %19, %13 : vector<1x256xi1>
    %21 = vector.broadcast %9 : i32 to vector<1x256xi32>
    %22 = arith.addi %11, %21 : vector<1x256xi32>
    %23 = arith.select %20, %22, %11 : vector<1x256xi1>, vector<1x256xi32>
    %c1_i32_8 = arith.constant 1 : i32
    %24 = vector.broadcast %c1_i32_8 : i32 to vector<1x256xi32>
    %25 = arith.cmpi sge, %23, %24 : vector<1x256xi32>
    %c1_i32_9 = arith.constant 1 : i32
    %26 = tpu.dynamic_rotate %6 by %c1_i32_9 dim 1 : vector<24x256xf32>, i32 -> vector<24x256xf32>
    %cst_10 = arith.constant 0.000000e+00 : f32
    %27 = vector.shape_cast %25 : vector<1x256xi1> to vector<1x256xi1>
    %28 = vector.broadcast %27 : vector<1x256xi1> to vector<24x256xi1>
    %29 = vector.broadcast %cst_10 : f32 to vector<24x256xf32>
    %30 = arith.select %28, %26, %29 : vector<24x256xi1>, vector<24x256xf32>
    %c2_i32 = arith.constant 2 : i32
    %31 = vector.broadcast %c2_i32 : i32 to vector<1x256xi32>
    %32 = arith.cmpi sge, %23, %31 : vector<1x256xi32>
    %c2_i32_11 = arith.constant 2 : i32
    %33 = tpu.dynamic_rotate %6 by %c2_i32_11 dim 1 : vector<24x256xf32>, i32 -> vector<24x256xf32>
    %cst_12 = arith.constant 0.000000e+00 : f32
    %34 = vector.shape_cast %32 : vector<1x256xi1> to vector<1x256xi1>
    %35 = vector.broadcast %34 : vector<1x256xi1> to vector<24x256xi1>
    %36 = vector.broadcast %cst_12 : f32 to vector<24x256xf32>
    %37 = arith.select %35, %33, %36 : vector<24x256xi1>, vector<24x256xf32>
    %c0_13 = arith.constant 0 : index
    %c0_14 = arith.constant 0 : index
    %38 = vector.load %arg3[%c0_13, %c0_14] : memref<24x1xf32, #tpu.memory_space<vmem>>, vector<24x1xf32>
    %39 = vector.broadcast %38 : vector<24x1xf32> to vector<24x256xf32>
    %40 = arith.mulf %37, %39 : vector<24x256xf32>
    %c0_15 = arith.constant 0 : index
    %c0_16 = arith.constant 0 : index
    %41 = vector.load %arg4[%c0_15, %c0_16] : memref<24x1xf32, #tpu.memory_space<vmem>>, vector<24x1xf32>
    %42 = vector.broadcast %41 : vector<24x1xf32> to vector<24x256xf32>
    %43 = arith.mulf %30, %42 : vector<24x256xf32>
    %44 = arith.addf %40, %43 : vector<24x256xf32>
    %c0_17 = arith.constant 0 : index
    %c0_18 = arith.constant 0 : index
    %45 = vector.load %arg5[%c0_17, %c0_18] : memref<24x1xf32, #tpu.memory_space<vmem>>, vector<24x1xf32>
    %46 = vector.broadcast %45 : vector<24x1xf32> to vector<24x256xf32>
    %47 = arith.mulf %6, %46 : vector<24x256xf32>
    %48 = arith.addf %44, %47 : vector<24x256xf32>
    %c0_19 = arith.constant 0 : index
    %c0_20 = arith.constant 0 : index
    %49 = vector.load %arg6[%c0_19, %c0_20] : memref<24x1xf32, #tpu.memory_space<vmem>>, vector<24x1xf32>
    %50 = vector.broadcast %49 : vector<24x1xf32> to vector<24x256xf32>
    %51 = arith.addf %48, %50 : vector<24x256xf32>
    %52 = vector.extract_strided_slice %51 {offsets = [0, 0], sizes = [8, 256], strides = [1, 1]} : vector<24x256xf32> to vector<8x256xf32>
    %53 = vector.extract_strided_slice %51 {offsets = [8, 0], sizes = [8, 256], strides = [1, 1]} : vector<24x256xf32> to vector<8x256xf32>
    %54 = vector.extract_strided_slice %51 {offsets = [16, 0], sizes = [8, 256], strides = [1, 1]} : vector<24x256xf32> to vector<8x256xf32>
    %c0_21 = arith.constant 0 : index
    %c0_22 = arith.constant 0 : index
    %55 = vector.load %arg7[%c0_21, %c0_22] : memref<8x256xf32, #tpu.memory_space<vmem>>, vector<8x256xf32>
    tpu.vector_store %arg7[%c0_21, %c0_22], %52 {strides = array<i32>} : memref<8x256xf32, #tpu.memory_space<vmem>>, vector<8x256xf32>,
    %56 = arith.mulf %54, %53 : vector<8x256xf32>
    %c0_23 = arith.constant 0 : index
    %c0_24 = arith.constant 0 : index
    %57 = vector.load %arg8[%c0_23, %c0_24] : memref<8x256xf32, #tpu.memory_space<vmem>>, vector<8x256xf32>
    tpu.vector_store %arg8[%c0_23, %c0_24], %56 {strides = array<i32>} : memref<8x256xf32, #tpu.memory_space<vmem>>, vector<8x256xf32>,
    return
  }
}

</mosaic_0001>

<bundles_post_ra>
// kernel: tpu_custom_call.1
= control target key start
LH: loop header
LB: loop body
LE: loop exit
PB: predicated region body
PF: predicated region fallthrough
CT: control target
= control target key end

     0   :  { %14 = vsyncpa [#allocation3], 0  ;;  %vm71_vm0 = vcmask 1043456   ;;  %v420_v4 = vmov 0   ;;  %vm64_vm1 = vcmask 64512   ;;  %s613_s0 = inlined_call_operand.vmem [shape: f32[8,256], index: 0, kind: input, shape index: {}]   ;;  %s614_s1 = inlined_call_operand.vmem [shape: bf16[24,8], index: 1, kind: input, shape index: {}]   ;;  %s615_s2 = inlined_call_operand.vmem [shape: f32[24,1], index: 2, kind: input, shape index: {}]   ;;  %s616_s3 = inlined_call_operand.vmem [shape: f32[24,1], index: 3, kind: input, shape index: {}]   ;;  %s617_s4 = inlined_call_operand.vmem [shape: f32[24,1], index: 4, kind: input, shape index: {}]   ;;  %s618_s5 = inlined_call_operand.vmem [shape: f32[24,1], index: 5, kind: input, shape index: {}]   ;;  %s619_s6 = inlined_call_operand.vmem [shape: f32[24,1], index: 6, kind: input, shape index: {}]   ;;  %s620_s7 = inlined_call_operand.hbm [shape: f32[8,256], index: 7, kind: output, shape index: {0}]   ;;  %s621_s8 = inlined_call_operand.hbm [shape: f32[8,256], index: 8, kind: output, shape index: {1}]  }
   0x1   :  { %v32_v0 = vld [vmem:[%s613_s0 + $0x8] sm:$0xff]  ;;  %v31_v1 = vld [vmem:[%s613_s0] sm:$0xff]  ;;  %110 = vmatprep.mubr.bf16.mxu0 %v420_v4  ;;  %120 = vmatprep.mubr.bf16.mxu1 %v420_v4  ;;  %v40_v10 = vld [vmem:[%s615_s2 + $0x10] sm:$0xff] }
   0x2   :  { %v37_v2 = vpack.c.bf16 %v32_v0, %v32_v0  ;;  %v36_v3 = vpack.c.bf16 %v31_v1, %v31_v1  ;;  %372 = vset.pattern.permute.xlu0 %v420_v4  ;;  %v39_v5 = vld [vmem:[%s615_s2 + $0x8] sm:$0xff]  ;;  %373 = vset.pattern.permute.xlu1 %v420_v4  ;;  %v374_v7 = vld [vmem:[%s614_s1] sm:$0xff]  }
   0x3   :  { %v375_v8 = vld [vmem:[%s614_s1 + $0x8] ss:$0 sps:$4 sm:$0xff]   ;;  %v38_v9 = vld [vmem:[%s615_s2] sm:$0xff]  ;;  %48 = vperm.xlu0 %372, %v39_v5  }
   0x4   :  { %362 = vmatprep.subr.msk.bf16.mxu0 %vm71_vm0, %v37_v2  ;;  %365 = vmatprep.subr.msk.bf16.mxu1 %vm71_vm0, %v37_v2  ;;  %v73_v6 = vsel %vm71_vm0, %v36_v3, 0  ;;  %v219_v11 = vld [vmem:[%s616_s3 + $0x8] sm:$0xff] }
   0x5   :  { %93 = vmatpush1.bf16.msra.mxu0 %v73_v6  ;;  %366 = vmatpush1.bf16.msra.mxu1 %v73_v6 }
   0x6   :  { %43 = vperm.xlu1 %373, %v38_v9  }
   0x7   :  { %15 = vsyncpa [#allocation5], 0  ;;  %53 = vperm.xlu0 %372, %v40_v10   ;;  %v220_v12 = vld [vmem:[%s616_s3 + $0x10] sm:$0xff]  ;;  %v243_v13 = vld [vmem:[%s617_s4 + $0x8] sm:$0xff]  ;;  %v129_v50 = vlaneseq  ;;  %s424_s17 = smov [#allocation4]  }
   0x8   :  { %363 = vmatmul.mubr.msk.bf16.vlgmr.msra.gmra.mxu0 %vm64_vm1, %v374_v7  ;;  %364 = vmatmul.mubr.msk.bf16.vlgmr.msra.gmra.mxu1 %vm64_vm1, %v375_v8  ;;  %v244_v14 = vld [vmem:[%s617_s4 + $0x10] sm:$0xff]  ;;  %v218_v15 = vld [vmem:[%s616_s3] sm:$0xff]  ;;  %v273_v17 = vld [vmem:[%s618_s5 + $0x8] sm:$0xff]  ;;  %s421_s3 = smov 1   ;;  %s348_s18 = sshll.u32 %s424_s17, 4  ;;  %s349_s18 = int_to_ptr.vmem [resolvable:$true] %s348_s18 }
   0x9   :  { %v242_v16 = vld [vmem:[%s617_s4] sm:$0xff]  ;;  %v274_v18 = vld [vmem:[%s618_s5 + $0x10] sm:$0xff]  ;;  %s422_s4 = smov 2   ;;  %v303_v37 = vld [vmem:[%s619_s6 + $0x8] sm:$0xff]  ;;  %v130_v53 = vand.u32 127, %v129_v50 }
   0xa   :  { %228 = vperm.xlu1 %373, %v219_v11   ;;  %v272_v19 = vld [vmem:[%s618_s5] sm:$0xff]  ;;  %v304_v38 = vld [vmem:[%s619_s6 + $0x10] sm:$0xff] }
   0xb   :  { %233 = vperm.xlu0 %372, %v220_v12   ;;  %v302_v39 = vld [vmem:[%s619_s6] sm:$0xff]  ;;  %v131_v56 = vadd.s32 128, %v130_v53  ;;  %vm170_vm2 = vcmp.lt.s32.totalorder %v130_v53, 1  ;;  %vm156_vm3 = vcmp.ge.s32.totalorder %v130_v53, 1  ;;  %vm201_vm5 = vcmp.lt.s32.totalorder %v130_v53, 2  ;;  %s423_s6 = smov [#allocation2]  }
   0xc   :  { %vm187_vm6 = vcmp.ge.s32.totalorder %v130_v53, 2  ;;  %s338_s16 = sshll.u32 %s423_s6, 4  ;;  %s339_s16 = int_to_ptr.vmem [resolvable:$true] %s338_s16 }
   0xd   :  { %v143_v59 = vand.u32 127, %v131_v56  ;;  %s376_s19 = scalar_lea.vmem %s339_s16, 256  ;;  %p381_p1 = scmp.lt.s32.totalorder %s339_s16, %s339_s16 }
   0xe   :  { %252 = vperm.xlu1 %373, %v243_v13   ;;  %p377_p0 = scmp.ne.s32.totalorder %s339_s16, %s376_s19  ;;  %p382_p2 = scmp.lt.s32.totalorder %s376_s19, %s376_s19 }
   0xf   :  { %257 = vperm.xlu0 %372, %v244_v14   ;;  %vm557_vm4 = vcmp.ge.s32.totalorder %v143_v59, 1  ;;  %vm566_vm7 = vcmp.ge.s32.totalorder %v143_v59, 2 }
  0x10   :  { %p383_p3 = por %p382_p2, %p381_p1 }
  0x12   :  { %223 = vperm.xlu1 %373, %v218_v15   ;;  %p384_p4 = pnand %p383_p3, %p377_p0 }
  0x13   :  { %247 = vperm.xlu0 %372, %v242_v16  }
  0x16   :  { %282 = vperm.xlu1 %373, %v273_v17  }
  0x17   :  { %287 = vperm.xlu0 %372, %v274_v18  }
  0x1a   :  { %277 = vperm.xlu1 %373, %v272_v19  }
  0x7e   :  { %v49_v20 = vpop.permute.xlu0 %48 }
  0x81   :  { %v44_v24 = vpop.permute.xlu1 %43 }
  0x82   :  { %v54_v21 = vpop.permute.xlu0 %53 }
  0x85   :  { %v229_v40 = vpop.permute.xlu1 %228 }
  0x86   :  { %v234_v41 = vpop.permute.xlu0 %233 }
  0x89   :  { %v253_v42 = vpop.permute.xlu1 %252 }
  0x8a   :  { %v258_v43 = vpop.permute.xlu0 %257 }
  0x8d   :  { %v224_v44 = vpop.permute.xlu1 %223 }
  0x8e   :  { %v248_v45 = vpop.permute.xlu0 %247 }
  0x91   :  { %v551_v46 = vpop.permute.xlu1 %282 }
  0x92   :  { %v553_v47 = vpop.permute.xlu0 %287 }
  0x95   :  { %v555_v48 = vpop.permute.xlu1 %277 }
  0xc8   :  { %v112_v22 = vpop.f32.mrf.mxu0  ;;  %v122_v23 = vpop.f32.mrf.mxu1 }
  0xc9   :  { %v518_v25 = vadd.f32 %v122_v23, %v54_v21  ;;  %v525_v32 = vadd.f32 %v112_v22, %v44_v24 }
  0xca   :  { %v114_v26 = vpop.f32.mrf.mxu0  ;;  %v124_v27 = vpop.f32.mrf.mxu1 }
  0xcb   :  { %v520_v28 = vadd.f32 %v114_v26, %v44_v24  ;;  %162 = vrot.lane.b32.xlu0 %v518_v25, %s421_s3  ;;  %v533_v35 = vadd.f32 %v124_v27, %v54_v21 }
  0xcc   :  { %v126_v29 = vpop.f32.mrf.mxu1  ;;  %v116_v31 = vpop.f32.mrf.mxu0 }
  0xcd   :  { %164 = vrot.lane.b32.xlu1 %v520_v28, %s421_s3  ;;  %v528_v33 = vadd.f32 %v116_v31, %v49_v20 }
  0xce   :  { %v127_v30 = vpop.f32.mrf.mxu1  ;;  %v118_v34 = vpop.f32.mrf.mxu0 }
  0xcf   :  { %193 = vrot.lane.b32.xlu0 %v518_v25, %s422_s4  ;;  %v536_v36 = vadd.f32 %v118_v34, %v49_v20 }
  0xd1   :  { %195 = vrot.lane.b32.xlu1 %v520_v28, %s422_s4 }
  0xd3   :  { %158 = vrot.lane.b32.xlu0 %v525_v32, %s421_s3 }
  0xd5   :  { %160 = vrot.lane.b32.xlu1 %v528_v33, %s421_s3 }
  0xd7   :  { %189 = vrot.lane.b32.xlu0 %v525_v32, %s422_s4 }
  0xd9   :  { %191 = vrot.lane.b32.xlu1 %v528_v33, %s422_s4 }
  0xdb   :  { %168 = vrot.lane.b32.xlu0 %v533_v35, %s421_s3 }
  0xdd   :  { %166 = vrot.lane.b32.xlu1 %v536_v36, %s421_s3 }
  0xdf   :  { %199 = vrot.lane.b32.xlu0 %v533_v35, %s422_s4 }
  0xe1   :  { %197 = vrot.lane.b32.xlu1 %v536_v36, %s422_s4 }
  0xe3   :  { %312 = vperm.xlu0 %372, %v303_v37  }
  0xe5   :  { %317 = vperm.xlu1 %373, %v304_v38  }
  0xe7   :  { %307 = vperm.xlu0 %372, %v302_v39  }
 0x13d   :  { %v163_v49 = vpop.permute.xlu0 %162 }
 0x13f   :  { %v165_v51 = vpop.permute.xlu1 %164 }
 0x141   :  { %v194_v52 = vpop.permute.xlu0 %193 }
 0x143   :  { %v196_v54 = vpop.permute.xlu1 %195 }
 0x145   :  { %v159_v55 = vpop.permute.xlu0 %158 }
 0x146   :  { %v171_v63 = vsel %vm170_vm2, %v159_v55, %v165_v51  ;;  %v174_v0 = vsel %vm170_vm2, %v165_v51, %v159_v55 }
 0x147   :  { %v161_v57 = vpop.permute.xlu1 %160  ;;  %v181_v2 = vsel %vm156_vm3, %v174_v0, 0.0  ;;  %v182_v3 = vsel %vm557_vm4, %v171_v63, 0.0 }
 0x149   :  { %v190_v58 = vpop.permute.xlu0 %189 }
 0x14a   :  { %v202_v6 = vsel %vm201_vm5, %v190_v58, %v196_v54  ;;  %v205_v7 = vsel %vm201_vm5, %v196_v54, %v190_v58  ;;  %v261_v54 = vmul.f32 %v248_v45, %v182_v3 }
 0x14b   :  { %v192_v60 = vpop.permute.xlu1 %191  ;;  %v212_v19 = vsel %vm187_vm6, %v205_v7, 0.0  ;;  %v213_v20 = vsel %vm566_vm7, %v202_v6, 0.0 }
 0x14c   :  { %v236_v37 = vmul.f32 %v224_v44, %v212_v19  ;;  %v237_v38 = vmul.f32 %v224_v44, %v213_v20 }
 0x14d   :  { %v169_v61 = vpop.permute.xlu0 %168 }
 0x14e   :  { %v173_v10 = vsel %vm170_vm2, %v163_v49, %v169_v61  ;;  %v176_v11 = vsel %vm170_vm2, %v169_v61, %v163_v49  ;;  %v267_v59 = vadd.f32 %v261_v54, %v237_v38 }
 0x14f   :  { %v167_v1 = vpop.permute.xlu1 %166  ;;  %v185_v23 = vsel %vm156_vm3, %v176_v11, 0.0  ;;  %v186_v24 = vsel %vm557_vm4, %v173_v10, 0.0 }
 0x150   :  { %v172_v12 = vsel %vm170_vm2, %v161_v57, %v167_v1  ;;  %v175_v13 = vsel %vm170_vm2, %v167_v1, %v161_v57  ;;  %v264_v39 = vmul.f32 %v258_v43, %v185_v23  ;;  %v265_v49 = vmul.f32 %v258_v43, %v186_v24 }
 0x151   :  { %v200_v5 = vpop.permute.xlu0 %199  ;;  %v183_v26 = vsel %vm156_vm3, %v175_v13, 0.0  ;;  %v184_v27 = vsel %vm557_vm4, %v172_v12, 0.0  ;;  %v290_v43 = vmul.f32 %v555_v48, %v525_v32 }
 0x152   :  { %v204_v8 = vsel %vm201_vm5, %v194_v52, %v200_v5  ;;  %v207_v9 = vsel %vm201_vm5, %v200_v5, %v194_v52  ;;  %v262_v50 = vmul.f32 %v253_v42, %v183_v26  ;;  %v263_v51 = vmul.f32 %v253_v42, %v184_v27 }
 0x153   :  { %v198_v14 = vpop.permute.xlu1 %197  ;;  %v216_v15 = vsel %vm187_vm6, %v207_v9, 0.0  ;;  %v217_v16 = vsel %vm566_vm7, %v204_v8, 0.0  ;;  %v260_v52 = vmul.f32 %v248_v45, %v181_v2  ;;  %v295_v42 = vmul.f32 %v553_v47, %v533_v35 }
 0x154   :  { %v203_v17 = vsel %vm201_vm5, %v192_v60, %v198_v14  ;;  %v206_v18 = vsel %vm201_vm5, %v198_v14, %v192_v60  ;;  %v240_v29 = vmul.f32 %v234_v41, %v216_v15  ;;  %v241_v30 = vmul.f32 %v234_v41, %v217_v16 }
 0x155   :  { %v214_v21 = vsel %vm187_vm6, %v206_v18, 0.0  ;;  %v215_v22 = vsel %vm566_vm7, %v203_v17, 0.0  ;;  %v266_v58 = vadd.f32 %v260_v52, %v236_v37  ;;  %v292_v60 = vmul.f32 %v551_v46, %v528_v33 }
 0x156   :  { %v238_v31 = vmul.f32 %v229_v40, %v214_v21  ;;  %v239_v34 = vmul.f32 %v229_v40, %v215_v22  ;;  %v270_v57 = vadd.f32 %v264_v39, %v240_v29  ;;  %v271_v53 = vadd.f32 %v265_v49, %v241_v30 }
 0x157   :  { %v293_v40 = vmul.f32 %v551_v46, %v536_v36  ;;  %v294_v41 = vmul.f32 %v553_v47, %v518_v25  ;;  %v291_v45 = vmul.f32 %v555_v48, %v520_v28  ;;  %v296_v36 = vadd.f32 %v290_v43, %v266_v58 }
 0x158   :  { %v268_v55 = vadd.f32 %v262_v50, %v238_v31  ;;  %v269_v56 = vadd.f32 %v263_v51, %v239_v34  ;;  %v301_v33 = vadd.f32 %v295_v42, %v271_v53 }
 0x159   :  { %v300_v63 = vadd.f32 %v294_v41, %v270_v57  ;;  %v297_v1 = vadd.f32 %v291_v45, %v267_v59 }
 0x15a   :  { %v298_v61 = vadd.f32 %v292_v60, %v268_v55  ;;  %v299_v62 = vadd.f32 %v293_v40, %v269_v56 }
 0x15e   :  { %v313_v44 = vpop.permute.xlu0 %312 }
 0x15f   :  { %v322_v25 = vadd.f32 %v313_v44, %v298_v61  ;;  %v323_v46 = vadd.f32 %v313_v44, %v299_v62 }
 0x160   :  { %v318_v0 = vpop.permute.xlu1 %317 }
 0x161   :  { %v324_v2 = vadd.f32 %v318_v0, %v300_v63  ;;  %v325_v35 = vadd.f32 %v318_v0, %v301_v33 }
 0x162   :  { %v308_v32 = vpop.permute.xlu0 %307 }
 0x163   :  { %v328_v47 = vmul.f32 %v324_v2, %v322_v25  ;;  %v329_v3 = vmul.f32 %v325_v35, %v323_v46  ;;  %v320_v4 = vadd.f32 %v308_v32, %v296_v36  ;;  %v321_v28 = vadd.f32 %v308_v32, %v297_v1 }
 0x165   :  { %330 = vst [vmem:[#allocation4] sm:$0xff] %v328_v47  ;;  %331 = vst [vmem:[#allocation4 + $0x8] sm:$0xff] %v329_v3 }
 0x166   :  { %326 = vst [vmem:[#allocation2] sm:$0xff] %v320_v4  ;;  %327 = vst [vmem:[#allocation2 + $0x8] sm:$0xff] %v321_v28 }
 0x167   :  { %387 = shalt.err (!%p384_p4)
}
 0x168   :  { %341 = dma.vmem_to_hbm [thread:$0]  %s339_s16, 256, %s620_s7, [#allocation3]  }
 0x169   :  { %s396_s21 = scalar_lea.vmem %s349_s18, 256  ;;  %p401_p6 = scmp.lt.s32.totalorder %s349_s18, %s349_s18 }
 0x16a   :  { %p397_p5 = scmp.ne.s32.totalorder %s349_s18, %s396_s21  ;;  %p402_p7 = scmp.lt.s32.totalorder %s396_s21, %s396_s21 }
 0x16c   :  { %p403_p8 = por %p402_p7, %p401_p6 }
 0x16e   :  { %p404_p9 = pnand %p403_p8, %p397_p5 }
 0x170   :  { %407 = shalt.err (!%p404_p9)
}
 0x171   :  { %351 = dma.vmem_to_hbm [thread:$0]  %s349_s18, 256, %s621_s8, [#allocation5]  }
 0x172   :  { %416 = dma.done.wait [#allocation3], 256  }
 0x173   :  { %417 = vsyncadd [#allocation3], 4294967040 }
 0x174   :  { %418 = dma.done.wait [#allocation5], 256  }
 0x175   :  { %419 = vsyncadd [#allocation5], 4294967040 }
 0x176   :  { %358 = vsyncpa [#allocation3], 1 }
 0x177   :  { %359 = vsyncpa [#allocation5], 1 }

</bundles_post_ra>
